<compile_context>
chip_gen: v7x
topology: tpu7x:2x2x1
jax: 0.10.0
libtpu: 0.0.40
codegen_flags: <defaults>
</compile_context>

<pallas_src>
import jax
import jax.numpy as jnp
from jax.experimental import pallas as pl
from jax.experimental.pallas import tpu as pltpu


def _identity_kernel(x_ref, o_ref):
    # Pure pass-through: copy the current tile unchanged.
    o_ref[...] = x_ref[...]


def identity_forward(x):
    """Pallas implementation of Identity.forward: returns x unchanged."""
    orig_shape = x.shape
    orig_dtype = x.dtype
    total = x.size

    if total == 0:
        # Nothing to copy.
        return x

    itemsize = jnp.dtype(orig_dtype).itemsize

    # ---- choose a lane-dense 2-D view -------------------------------------
    if total % 128 == 0:
        # Widest trailing dim that is a multiple of 128 and divides the total
        # element count (capped so a single row never blows up a tile).
        max_cols = 16384
        cols = 128
        c = 256
        limit = min(max_cols, total)
        while c <= limit:
            if total % c == 0:
                cols = c
            c += 128
        rows = total // cols
    elif x.ndim >= 2:
        # TODO(synk): pad the trailing dim to a multiple of 128 for fully
        # unmasked lane stores; fall back to the natural 2-D view for now.
        cols = orig_shape[-1]
        rows = total // cols
    else:
        cols = total
        rows = 1

    view = x.reshape(rows, cols)

    # ---- row tiling (~2 MiB per block, multiple of 8 rows) -----------------
    target_tile_bytes = 2 * 1024 * 1024
    bytes_per_row = cols * itemsize
    rows_per_tile = max(1, target_tile_bytes // bytes_per_row)
    if rows <= rows_per_tile:
        block_rows = rows                      # single block; full-extent dims
    else:
        block_rows = max(8, (rows_per_tile // 8) * 8)   # (8,128)-aligned tiles
        block_rows = min(block_rows, rows)
    grid = (pl.cdiv(rows, block_rows),)

    out = pl.pallas_call(
        _identity_kernel,
        out_shape=jax.ShapeDtypeStruct((rows, cols), orig_dtype),
        grid=grid,
        in_specs=[pl.BlockSpec((block_rows, cols), lambda i: (i, 0))],
        out_specs=pl.BlockSpec((block_rows, cols), lambda i: (i, 0)),
        compiler_params=pltpu.CompilerParams(
            dimension_semantics=("parallel",),
        ),
        cost_estimate=pl.CostEstimate(
            flops=0,
            transcendentals=0,
            bytes_accessed=2 * total * itemsize,  # read x + write out
        ),
    )(view)

    return out.reshape(orig_shape)


if __name__ == "__main__":
    key = jax.random.PRNGKey(0)
    # Small GNN-like input consistent with the SANE search space usage:
    # 8 nodes, hidden dim 32.
    x = jax.random.normal(key, (8, 32), dtype=jnp.float32)

    out = identity_forward(x)
    out = jax.block_until_ready(out)

    # Identity semantics: output is bit-identical to the input.
    assert out.shape == x.shape and out.dtype == x.dtype
    assert bool(jnp.all(out == x))

    print("KERNEL_OK")
</pallas_src>

<mosaic_0001>
module attributes {stable_mosaic.version = 11 : i64} {
  func.func @_identity_kernel(%arg0: i32, %arg1: memref<1x256xf32, #tpu.memory_space<vmem>>, %arg2: memref<1x256xf32, #tpu.memory_space<vmem>>) attributes {dimension_semantics = [#tpu.dimension_semantics<parallel>], iteration_bounds = array<i64: 1>, scalar_prefetch = 0 : i64, scratch_operands = 0 : i64, tpu.core_type = #tpu.core_type<tc>, window_params = [{transform_indices = @transform_0, window_bounds = array<i64: 1, 256>}, {transform_indices = @transform_1, window_bounds = array<i64: 1, 256>}]} {
    %c0 = arith.constant 0 : index
    %c0_0 = arith.constant 0 : index
    %0 = vector.load %arg1[%c0, %c0_0] : memref<1x256xf32, #tpu.memory_space<vmem>>, vector<1x256xf32>
    %c0_1 = arith.constant 0 : index
    %c0_2 = arith.constant 0 : index
    %1 = vector.load %arg2[%c0_1, %c0_2] : memref<1x256xf32, #tpu.memory_space<vmem>>, vector<1x256xf32>
    tpu.vector_store %arg2[%c0_1, %c0_2], %0 {strides = array<i32>} : memref<1x256xf32, #tpu.memory_space<vmem>>, vector<1x256xf32>,
    return
  }
  func.func @transform_0(%arg0: i32) -> (i32, i32) {
    %c0_i32 = arith.constant 0 : i32
    %c0_i32_0 = arith.constant 0 : i32
    return %arg0, %c0_i32 : i32, i32
  }
  func.func @transform_1(%arg0: i32) -> (i32, i32) {
    %c0_i32 = arith.constant 0 : i32
    %c0_i32_0 = arith.constant 0 : i32
    return %arg0, %c0_i32 : i32, i32
  }
}

</mosaic_0001>

<bundles_post_ra>
// kernel: tpu_custom_call.1
= control target key start
LH: loop header
LB: loop body
LE: loop exit
PB: predicated region body
PF: predicated region fallthrough
CT: control target
= control target key end

     0   :  { %6 = vsyncpa [#allocation3], 0  ;;  %s128_s0 = inlined_call_operand.hbm [shape: f32[1,256], index: 0, kind: input, shape index: {}]   ;;  %s129_s1 = inlined_call_operand.hbm [shape: f32[1,256], index: 1, kind: output, shape index: {}]  }
   0x1   :  { %7 = vsyncpa [#allocation4], 0  ;;  %s92_s6 = smov [#allocation2]   ;;  %s44_s10 = scalar_lea.hbm %s128_s0, 32 }
   0x2   :  { %s14_s7 = sshll.u32 %s92_s6, 4  ;;  %p45_p0 = scmp.ne.s32.totalorder %s128_s0, %s44_s10  ;;  %s15_s7 = int_to_ptr.vmem [resolvable:$true] %s14_s7 }
   0x3   :  { %p48_p1 = scmp.lt.u32.totalorder %s44_s10, %s128_s0 }
   0x5   :  { %p50_p2 = pnand %p48_p1, %p45_p0 }
   0x7   :  { %53 = shalt.err (!%p50_p2)
}
   0x8   :  { %s54_s15 = scalar_lea.vmem %s15_s7, 32  ;;  %p59_p4 = scmp.lt.s32.totalorder %s15_s7, %s15_s7 }
   0x9   :  { %p55_p3 = scmp.ne.s32.totalorder %s15_s7, %s54_s15  ;;  %p60_p5 = scmp.lt.s32.totalorder %s54_s15, %s54_s15 }
   0xb   :  { %p61_p6 = por %p60_p5, %p59_p4 }
   0xd   :  { %p62_p7 = pnand %p61_p6, %p55_p3 }
   0xf   :  { %65 = shalt.err (!%p62_p7)
}
  0x10   :  { %17 = dma.hbm_to_vmem [thread:$0]  %s128_s0, 32, %s15_s7, [#allocation3]  }
  0x11   :  { %88 = dma.done.wait [#allocation3], 32  }
  0x12   :  { %89 = vsyncadd [#allocation3], 4294967264  ;;  %v22_v0 = vlaneseq  ;;  %s93_s18 = smov [#allocation5]   ;;  %v21_v1 = vld [vmem:[#allocation2] sm:$0x3] }
  0x13   :  { %s33_s19 = sshll.u32 %s93_s18, 4  ;;  %s34_s19 = int_to_ptr.vmem [resolvable:$true] %s33_s19 }
  0x14   :  { %vm24_vm0 = vcmp.lt.s32.totalorder %v22_v0, 256  ;;  %s66_s20 = scalar_lea.vmem %s34_s19, 32  ;;  %p71_p9 = scmp.lt.s32.totalorder %s34_s19, %s34_s19 }
  0x15   :  { %26 = vst.msk [vmem:[#allocation5] sm:$0x3] %vm24_vm0, %v21_v1  ;;  %p67_p8 = scmp.ne.s32.totalorder %s34_s19, %s66_s20  ;;  %p72_p10 = scmp.lt.s32.totalorder %s66_s20, %s66_s20 }
  0x17   :  { %p73_p11 = por %p72_p10, %p71_p9 }
  0x19   :  { %p74_p12 = pnand %p73_p11, %p67_p8 }
  0x1b   :  { %77 = shalt.err (!%p74_p12)
}
  0x1c   :  { %s78_s0 = scalar_lea.hbm %s129_s1, 32 }
  0x1d   :  { %p79_p13 = scmp.ne.s32.totalorder %s129_s1, %s78_s0  ;;  %p82_p0 = scmp.lt.u32.totalorder %s78_s0, %s129_s1 }
  0x1f   :  { %p84_p1 = pnand %p82_p0, %p79_p13 }
  0x21   :  { %87 = shalt.err (!%p84_p1)
}
  0x22   :  { %36 = dma.vmem_to_hbm [thread:$0]  %s34_s19, 32, %s129_s1, [#allocation4]  }
  0x23   :  { %90 = dma.done.wait [#allocation4], 32  }
  0x24   :  { %91 = vsyncadd [#allocation4], 4294967264 }
  0x25   :  { %40 = vsyncpa [#allocation3], 1 }
  0x26   :  { %41 = vsyncpa [#allocation4], 1 }

</bundles_post_ra>
